<compile_context>
chip_gen: v5e
topology: v5e:2x2
jax: 0.10.0
libtpu: 0.0.40
codegen_flags: <defaults>
</compile_context>

<pallas_src>
import functools
import math

import jax
import jax.numpy as jnp
from jax.experimental import pallas as pl
from jax.experimental.pallas import tpu as pltpu


# ----------------------------------------------------------------------------
# Sinusoid table — mirrors SinusoidalPositionalEmbedding.get_embedding exactly.
# This corresponds to the module's cached `self.weights` (one-time setup).
# ----------------------------------------------------------------------------
def _get_embedding_table(num_embeddings, embed_dim, padding_idx):
    half_dim = embed_dim // 2
    scale = math.log(10000.0) / (half_dim - 1)
    inv_freq = jnp.exp(jnp.arange(half_dim, dtype=jnp.float32) * (-scale))
    pos = jnp.arange(num_embeddings, dtype=jnp.float32)[:, None]
    ang = pos * inv_freq[None, :]                                   # [N, half]
    emb = jnp.concatenate([jnp.sin(ang), jnp.cos(ang)], axis=1)     # [N, 2*half]
    if embed_dim % 2 == 1:
        emb = jnp.concatenate([emb, jnp.zeros((num_embeddings, 1), jnp.float32)], axis=1)
    if padding_idx is not None:
        emb = emb.at[padding_idx, :].set(0.0)
    return emb                                                      # [N, embed_dim]


# ----------------------------------------------------------------------------
# Kernel: one batch row per grid step.
#   tok_ref : [1, S, 1] int32   — token ids of this batch element
#   emb_ref : [S, D]    float32 — sinusoid rows for positions pad+1 .. pad+S
#   o_ref   : [1, S, D] float32 — output embeddings
# Pad tokens (id == padding_idx) get the all-zero embedding (== weights[pad] row).
# ----------------------------------------------------------------------------
def _sinpos_kernel(tok_ref, emb_ref, o_ref, *, padding_idx):
    keep = tok_ref[...] != padding_idx                  # [1, S, 1] bool
    emb = emb_ref[...][None, :, :]                      # [1, S, D]
    o_ref[...] = jnp.where(keep, emb, 0.0)              # lane-broadcast select


# ----------------------------------------------------------------------------
# Public wrapper — matches SinusoidalPositionalEmbedding.forward(x)
#   x: [bsz, seq_len] integer token ids  ->  [bsz, seq_len, embed_dim] float32
# ----------------------------------------------------------------------------
@functools.partial(jax.jit, static_argnums=(1, 2))
def sinusoidal_positional_embedding_pallas(x, embed_dim, padding_idx):
    bsz, seq_len = x.shape
    max_pos = padding_idx + 1 + seq_len
    # TODO(synk): the module's lazy cache-growth check (`max_pos > weights.size(0)`)
    # is host-side Python state; here the table is rebuilt (constant-folded) per jit trace.
    weights = _get_embedding_table(max_pos, embed_dim, padding_idx)
    # index_select with make_positions == static slice of rows pad+1 .. pad+seq_len
    emb_rows = weights[padding_idx + 1: padding_idx + 1 + seq_len]   # [S, D]

    tok = x.astype(jnp.int32).reshape(bsz, seq_len, 1)

    return pl.pallas_call(
        functools.partial(_sinpos_kernel, padding_idx=int(padding_idx)),
        out_shape=jax.ShapeDtypeStruct((bsz, seq_len, embed_dim), jnp.float32),
        grid=(bsz,),
        in_specs=[
            pl.BlockSpec((1, seq_len, 1), lambda b: (b, 0, 0)),          # tokens, per batch
            pl.BlockSpec((seq_len, embed_dim), lambda b: (0, 0)),        # table slice, resident
        ],
        out_specs=pl.BlockSpec((1, seq_len, embed_dim), lambda b: (b, 0, 0)),
        compiler_params=pltpu.CompilerParams(dimension_semantics=("parallel",)),
    )(tok, emb_rows)


# ----------------------------------------------------------------------------
# Pure-JAX reference mirroring the PyTorch forward (full table + gather path)
# ----------------------------------------------------------------------------
def sinusoidal_positional_embedding_ref(x, embed_dim, padding_idx):
    bsz, seq_len = x.shape
    max_pos = padding_idx + 1 + seq_len
    weights = _get_embedding_table(max_pos, embed_dim, padding_idx)
    mask = (x != padding_idx).astype(jnp.int32)
    range_buf = (jnp.broadcast_to(jnp.arange(seq_len, dtype=jnp.int32)[None, :], x.shape)
                 + padding_idx + 1)
    positions = range_buf * mask + padding_idx * (1 - mask)
    return weights[positions.reshape(-1)].reshape(bsz, seq_len, embed_dim)


if __name__ == "__main__":
    # Small shapes: batch=2, seq_len=8, embed_dim=32, padding_idx=1
    B, S, D, PAD = 2, 8, 32, 1
    key = jax.random.PRNGKey(0)
    x = jax.random.randint(key, (B, S), 4, 20, dtype=jnp.int32)   # ids, never PAD by chance
    x = x.at[0, S - 2:].set(PAD)                                  # pad tail of batch 0
    x = x.at[1, 0].set(PAD)                                       # pad head of batch 1

    out = jax.block_until_ready(sinusoidal_positional_embedding_pallas(x, D, PAD))
    ref = jax.block_until_ready(sinusoidal_positional_embedding_ref(x, D, PAD))

    assert out.shape == (B, S, D) and out.dtype == jnp.float32
    err = float(jnp.max(jnp.abs(out - ref)))
    assert math.isfinite(err) and err <= 1e-6, f"max abs err too large: {err}"
    print("KERNEL_OK")
</pallas_src>

<mosaic_0001>
module attributes {stable_mosaic.version = 11 : i64} {
  func.func @_sinpos_kernel(%arg0: i32, %arg1: memref<1x8x1xi32, #tpu.memory_space<vmem>>, %arg2: memref<8x32xf32, #tpu.memory_space<vmem>>, %arg3: memref<1x8x32xf32, #tpu.memory_space<vmem>>) attributes {dimension_semantics = [#tpu.dimension_semantics<parallel>], iteration_bounds = array<i64: 2>, scalar_prefetch = 0 : i64, scratch_operands = 0 : i64, tpu.core_type = #tpu.core_type<tc>, window_params = [{transform_indices = @transform_0, window_bounds = array<i64: 1, 8, 1>}, {pipeline_mode = #tpu.pipeline_mode<synchronous>, transform_indices = @transform_1, window_bounds = array<i64: 8, 32>}, {transform_indices = @transform_2, window_bounds = array<i64: 1, 8, 32>}]} {
    %c0 = arith.constant 0 : index
    %c0_0 = arith.constant 0 : index
    %c0_1 = arith.constant 0 : index
    %0 = vector.load %arg1[%c0, %c0_0, %c0_1] : memref<1x8x1xi32, #tpu.memory_space<vmem>>, vector<1x8x1xi32>
    %c1_i32 = arith.constant 1 : i32
    %1 = vector.broadcast %c1_i32 : i32 to vector<1x8x1xi32>
    %2 = arith.cmpi ne, %0, %1 : vector<1x8x1xi32>
    %c0_2 = arith.constant 0 : index
    %c0_3 = arith.constant 0 : index
    %3 = vector.load %arg2[%c0_2, %c0_3] : memref<8x32xf32, #tpu.memory_space<vmem>>, vector<8x32xf32>
    %4 = vector.shape_cast %3 : vector<8x32xf32> to vector<1x8x32xf32>
    %cst = arith.constant 0.000000e+00 : f32
    %5 = vector.shape_cast %2 : vector<1x8x1xi1> to vector<1x8x1xi1>
    %6 = vector.broadcast %5 : vector<1x8x1xi1> to vector<1x8x32xi1>
    %7 = vector.broadcast %cst : f32 to vector<1x8x32xf32>
    %8 = arith.select %6, %4, %7 : vector<1x8x32xi1>, vector<1x8x32xf32>
    %c0_4 = arith.constant 0 : index
    %c0_5 = arith.constant 0 : index
    %c0_6 = arith.constant 0 : index
    %9 = vector.load %arg3[%c0_4, %c0_5, %c0_6] : memref<1x8x32xf32, #tpu.memory_space<vmem>>, vector<1x8x32xf32>
    tpu.vector_store %arg3[%c0_4, %c0_5, %c0_6], %8 {strides = array<i32>} : memref<1x8x32xf32, #tpu.memory_space<vmem>>, vector<1x8x32xf32>,
    return
  }
  func.func @transform_0(%arg0: i32) -> (i32, i32, i32) {
    %c0_i32 = arith.constant 0 : i32
    %c0_i32_0 = arith.constant 0 : i32
    %c0_i32_1 = arith.constant 0 : i32
    return %arg0, %c0_i32, %c0_i32_0 : i32, i32, i32
  }
  func.func @transform_1(%arg0: i32) -> (i32, i32) {
    %c0_i32 = arith.constant 0 : i32
    %c0_i32_0 = arith.constant 0 : i32
    %c0_i32_1 = arith.constant 0 : i32
    return %c0_i32, %c0_i32_0 : i32, i32
  }
  func.func @transform_2(%arg0: i32) -> (i32, i32, i32) {
    %c0_i32 = arith.constant 0 : i32
    %c0_i32_0 = arith.constant 0 : i32
    %c0_i32_1 = arith.constant 0 : i32
    return %arg0, %c0_i32, %c0_i32_0 : i32, i32, i32
  }
}

</mosaic_0001>

<bundles_post_ra>
// kernel: sinusoidal_positional_embedding_pallas.1
= control target key start
LH: loop header
LB: loop body
LE: loop exit
PB: predicated region body
PF: predicated region fallthrough
CT: control target
= control target key end

     0   :  { %7 = vsyncpa [#allocation3], 0  ;;  %s444_s0 = inlined_call_operand.vmem [shape: s32[2,8,1], index: 0, kind: input, shape index: {}]   ;;  %s445_s1 = inlined_call_operand.vmem [shape: f32[8,32], index: 1, kind: input, shape index: {}]   ;;  %s446_s2 = inlined_call_operand.hbm [shape: f32[2,8,32], index: 2, kind: output, shape index: {}]  }
   0x1   :  { %9 = vsyncpa [#allocation3 + $0x1], 0  ;;  %s356_s9 = smov 0   ;;  %s358_s10 = smov 0  }
   0x2   :  { %s360_s11 = smov 0   ;;  %s362_s12 = smov 0  }
   0x3 LB: > { %s377_s13 = sadd.s32 4294967295, %s338_s12   ;;  %s225_s14 = sadd.s32 4294967294, %s338_s12   ;;  %s338_s12 = sphi %s362_s12, %s452_s12   ;;  %s334_s11 = sphi %s360_s11, %s451_s11   ;;  %s330_s10 = sphi %s358_s10, %s450_s10   ;;  %s326_s9 = sphi %s356_s9, %s449_s9  }
   0x4   : > { %s381_s15 = sadd.s32 1, %s338_s12   ;;  %s69_s16 = sadd.s32 1, %s334_s11 }
   0x5   : > { %s66_s17 = ssub.s32 %s338_s12, %s381_s15  ;;  %p79_p0 = scmp.ne.s32.totalorder %s334_s11, %s330_s10 }
   0x6   : > { %p67_p1 = scmp.eq.s32.totalorder %s66_s17, 0  ;;  %p80_p2 = scmp.eq.s32.totalorder %s377_s13, 1 }
   0x7   : > { %p85_p3 = scmp.ne.s32.totalorder %s330_s10, %s326_s9  ;;  %p86_p4 = scmp.eq.s32.totalorder %s225_s14, 1 }
   0x8   : > { %s392_s18 = scalar_select %p67_p1, %s334_s11, %s69_s16  }
   0x9   : > { %p394_p5 = por %p80_p2, %p79_p0  ;;  %p398_p6 = por %p86_p4, %p85_p3 }
   0xa   : > { %p228_p7 = scmp.ge.s32.totalorder %s338_s12, 1  ;;  %p114_p8 = scmp.lt.s32.totalorder %s338_s12, 3 }
   0xc   : > { %p115_p9 = pnand %p228_p7, %p114_p8 }
   0xd   : > { %p135_p10 = scmp.lt.s32.totalorder (!%p115_p9), %s377_s13, 1  ;;  %s132_s26 = sand.u32 (!%p115_p9), 1, %s330_s10  }
   0xe   : > { %118 = sbr.rel (%p115_p9) target bundleno = 146 (0x92), region = 28  ;;  %s229_s27 = sshll.u32 (!%p115_p9), %s132_s26, 3 }
   0xf   : > { %s232_s28 = sshll.u32 (!%p115_p9), %s377_s13, 3  ;;  %s134_s4 = scalar_lea.vmem (!%p115_p9), [#allocation2], %s229_s27 }
  0x10   : > { %s161_s3 = scalar_lea.hbm (!%p115_p9), %s446_s2, %s232_s28  ;;  %s163_s5 = sshll.u32 (!%p115_p9), %s134_s4, 4  ;;  %s164_s5 = int_to_ptr.vmem [resolvable:$true] %s163_s5 }
  0x11   : > { %s165_s6 = sshll.u32 (!%p115_p9), %s161_s3, 4  ;;  %s166_s6 = int_to_ptr.hbm [resolvable:$true] %s165_s6 }
  0x12   : > { %s290_s14 = sshra.s32 (!%p115_p9), %s166_s6, 4  ;;  %s291_s14 = int_to_ptr.hbm [resolvable:$true] %s290_s14 }
  0x13   : > { %v340_v0 = vmov 0   ;;  %s136_s21 = scalar_select %p135_p10, %s377_s13, 1  ;;  %v141_v3 = vld [vmem:[%s445_s1] sm:$0xff]  ;;  %vm148_vm1 = vcmask 261120  }
  0x14   : > { %275 = vset.pattern.permute.xlu0 %v340_v0  ;;  %s151_s13 = scalar_lea.sflag [#allocation3], %s132_s26  ;;  %s292_s16 = scalar_lea.hbm %s291_s14, 8 }
  0x15   : > { %s230_s22 = sshll.u32 %s136_s21, 3  ;;  %p293_p11 = scmp.ne.s32.totalorder %s291_s14, %s292_s16 }
  0x16   : > { %s138_s25 = scalar_lea.vmem %s444_s0, %s230_s22  ;;  %s296_s22 = scalar_lea.hbm %s446_s2, 16 }
  0x17   : > { %v139_v1 = vld [vmem:[%s138_s25] sm:$0xff]  ;;  %p294_p12 = pnand %p293_p11, %p394_p5  ;;  %p297_p0 = scmp.lt.s32.totalorder %s291_s14, %s446_s2 }
  0x18   : > { %vm140_vm0 = vcmp.ne.s32.totalorder %v139_v1, 1  ;;  %p298_p1 = scmp.lt.s32.totalorder %s296_s22, %s292_s16 }
  0x19   : > { %v142_v2 = vsel %vm140_vm0, 1, %v340_v0  ;;  %p295_p13 = pneg %p294_p12 }
  0x1a   : > { %144 = vperm.xlu0 %275, %v142_v2   ;;  %p299_p2 = por %p298_p1, %p297_p0 }
  0x1c   : > { %p300_p3 = pnand %p299_p2, %p295_p13 }
  0x8c   : > { %v145_v4 = vpop.permute.xlu0 %144 }
  0x8d   : > { %vm146_vm2 = vcmp.eq.s32.totalorder %v145_v4, 1 }
  0x8e   : > { %v147_v5 = vsel %vm146_vm2, %v141_v3, 0.0 }
  0x8f   : > { %149 = vst.msk [vmem:[%s134_s4] sm:$0xff] %vm148_vm1, %v147_v5 }
  0x90   : > { %303 = shalt.err (!%p300_p3)
}
  0x91   : > { %235 = dma.vmem_to_hbm [thread:$0]  (%p394_p5), %s164_s5, 128, %s166_s6, %s151_s13  }
  0x92 PF: > { %p241_p4 = scmp.ge.s32.totalorder %s338_s12, 2  ;;  %s177_s25 = sand.u32 1, %s326_s9  }
  0x93   : > { %s178_s26 = scalar_lea.sflag [#allocation3], %s177_s25 }
  0x94   : > { %p238_p7 = pnand %p241_p4, %p398_p6 }
  0x96   : > { %p239_p8 = pneg %p238_p7 }
  0x98   : > { %321 = dma.done.wait (%p239_p8), %s178_s26, 128  }
  0x99   : > { %323 = vsyncadd (%p239_p8), %s178_s26, 4294967168  ;;  %p12_p9 = scmp.ge.s32.totalorder %s381_s15, 4   ;;  %s449_s9 = smov %s330_s10 }
  0x9a   : > { %s450_s10 = smov %s334_s11  ;;  %s451_s11 = smov %s392_s18 }
  0x9b   : > { %s452_s12 = smov %s381_s15  ;;  %14 = sbr.rel (!%p12_p9) target bundleno = 3 (0x3), region = 63 }
  0xa0   :  { %184 = vsyncpa [#allocation3], 1 }
  0xa1   :  { %186 = vsyncpa [#allocation3 + $0x1], 1 }

</bundles_post_ra>
